<compile_context>
chip_gen: v5e
topology: v5e:2x2
jax: 0.10.0
libtpu: 0.0.40
codegen_flags: <defaults>
</compile_context>

<pallas_src>
import jax
import jax.numpy as jnp
from jax.experimental import pallas as pl
from jax.experimental.pallas import tpu as pltpu


def _dummy_kernel(p_ref, wconv_ref, bconv_ref, pool_ref, wfc_ref, bfc_ref, o_ref):
    """One batch tile (b_tile images) per grid step.

    p_ref     : (9*Cin, b_tile*HW)   bf16 transposed im2col patches (K on sublanes,
                                     batch*spatial lane-dense)
    wconv_ref : (Cout, 9*Cin)        bf16 conv weights, taps flattened into K
    bconv_ref : (Cout, 1)            f32 conv bias (broadcasts over lanes)
    pool_ref  : (b_tile, b_tile*HW)  f32 constant block-diagonal pooling matrix (1/HW)
    wfc_ref   : (Cout, NC_pad)       f32 linear weight, classes zero-padded to 128
    bfc_ref   : (1, NC_pad)          f32 linear bias, zero-padded
    o_ref     : (b_tile, NC_pad)     f32 logits, lane-dense (unmasked stores)
    """
    # --- iptnet: conv3x3 as ONE fused K=9*Cin matmul (bf16 in, f32 acc) + bias + ReLU
    acc = jnp.dot(wconv_ref[...], p_ref[...],
                  preferred_element_type=jnp.float32)          # (Cout, b_tile*HW)
    acc = jnp.maximum(acc + bconv_ref[...], 0.0)

    # --- classifier: global average pool on the MXU.
    # Lane-contracted dot_general (flash-attention q@k^T pattern) -> MXU
    # transposed-weight push; no activation transpose materialized.
    pooled = jax.lax.dot_general(
        pool_ref[...], acc, (((1,), (1,)), ((), ())),
        preferred_element_type=jnp.float32)                    # (b_tile, Cout)

    # --- classifier: linear -> lane-dense padded logits.
    logits = jnp.dot(pooled, wfc_ref[...],
                     preferred_element_type=jnp.float32)       # (b_tile, NC_pad)
    o_ref[...] = logits + bfc_ref[...]


def dummy_forward(x_nchw, wconv_oihw, bconv, wfc_oc_ic, bfc, *, b_tile=8):
    """Dummy.forward: classifier(iptnet(x)). Input x is NCHW (PyTorch layout)."""
    N, Cin, H, W = x_nchw.shape
    Cout = wconv_oihw.shape[0]
    NC = wfc_oc_ic.shape[0]
    HW = H * W
    K = 9 * Cin
    NC_pad = ((NC + 127) // 128) * 128              # lane-dense output width
    L = b_tile * HW                                 # lanes per grid step

    num_tiles = pl.cdiv(N, b_tile)
    n_pad = num_tiles * b_tile
    # The per-tile im2col column block must be lane-aligned when tiled
    # (true for 16x16 feature maps: b_tile*256 is a multiple of 128).
    assert num_tiles == 1 or L % 128 == 0, (
        "pad the lane (column) axis of patches_t if b_tile*H*W % 128 != 0")

    x_f32 = x_nchw.astype(jnp.float32)
    if n_pad != N:
        x_f32 = jnp.pad(x_f32, ((0, n_pad - N), (0, 0), (0, 0), (0, 0)))

    # ---- wrapper-side im2col, NCHW-native (outer-dim permutes only) ----
    x_p = jnp.pad(x_f32, ((0, 0), (0, 0), (1, 1), (1, 1)))          # "same" zero pad
    taps = [x_p[:, :, kh:kh + H, kw:kw + W]                          # 9 x (n, Cin, H, W)
            for kh in range(3) for kw in range(3)]
    patches = jnp.stack(taps, axis=0)                                # (9, n, Cin, H, W)
    patches = jnp.transpose(patches, (2, 0, 1, 3, 4))                # (Cin, 9, n, H, W)
    patches_t = patches.reshape(K, n_pad * HW).astype(jnp.bfloat16)  # K = cin*9 + tap

    # Conv weight OIHW -> (Cout, Cin*9): flat K order cin*9 + kh*3 + kw matches patches.
    wconv_t = wconv_oihw.reshape(Cout, K).astype(jnp.bfloat16)
    bconv2d = bconv.reshape(Cout, 1).astype(jnp.float32)

    # Constant pooling matrix, built once here (resident VMEM constant in the kernel).
    col_img = jnp.arange(L, dtype=jnp.int32) // HW
    pool_mat = (jnp.arange(b_tile, dtype=jnp.int32)[:, None] == col_img[None, :])
    pool_mat = pool_mat.astype(jnp.float32) * (1.0 / HW)             # (b_tile, L)

    # Linear: (NC, Cout) -> (Cout, NC) zero-padded to NC_pad lane-dense columns.
    wfc = jnp.transpose(wfc_oc_ic, (1, 0)).astype(jnp.float32)
    wfc_pad = jnp.pad(wfc, ((0, 0), (0, NC_pad - NC)))
    bfc_pad = jnp.pad(bfc.astype(jnp.float32), (0, NC_pad - NC)).reshape(1, NC_pad)

    out = pl.pallas_call(
        _dummy_kernel,
        grid=(num_tiles,),
        in_specs=[
            pl.BlockSpec((K, L), lambda i: (0, i)),           # im2col columns for tile i
            pl.BlockSpec((Cout, K), lambda i: (0, 0)),        # resident conv weight
            pl.BlockSpec((Cout, 1), lambda i: (0, 0)),        # conv bias
            pl.BlockSpec((b_tile, L), lambda i: (0, 0)),      # resident pooling matrix
            pl.BlockSpec((Cout, NC_pad), lambda i: (0, 0)),   # resident FC weight
            pl.BlockSpec((1, NC_pad), lambda i: (0, 0)),      # FC bias
        ],
        out_specs=pl.BlockSpec((b_tile, NC_pad), lambda i: (i, 0)),
        out_shape=jax.ShapeDtypeStruct((n_pad, NC_pad), jnp.float32),
        compiler_params=pltpu.CompilerParams(
            dimension_semantics=("parallel",)),
    )(patches_t, wconv_t, bconv2d, pool_mat, wfc_pad, bfc_pad)

    return out[:N, :NC]


if __name__ == "__main__":
    key = jax.random.PRNGKey(0)
    k1, k2, k3, k4, k5 = jax.random.split(key, 5)

    N, Cin, H, W = 2, 4, 16, 16
    Cout, NC = 8, 10

    # Deterministic synthetic parameters (PyTorch layouts: OIHW conv, (out,in) linear).
    x = jax.random.normal(k1, (N, Cin, H, W), jnp.float32)
    wconv = jax.random.normal(k2, (Cout, Cin, 3, 3), jnp.float32) * 0.1
    bconv = jax.random.normal(k3, (Cout,), jnp.float32) * 0.1
    wfc = jax.random.normal(k4, (NC, Cout), jnp.float32) * 0.1
    bfc = jax.random.normal(k5, (NC,), jnp.float32) * 0.1

    out = dummy_forward(x, wconv, bconv, wfc, bfc)
    jax.block_until_ready(out)

    # Pure-JAX f32 reference for correctness (kernel uses bf16 operands + f32 acc).
    conv = jax.lax.conv_general_dilated(
        x, wconv, window_strides=(1, 1), padding="SAME",
        dimension_numbers=("NCHW", "OIHW", "NCHW")) + bconv[None, :, None, None]
    feat = jnp.maximum(conv, 0.0).mean(axis=(2, 3))                  # (N, Cout)
    ref = feat @ wfc.T + bfc                                         # (N, NC)

    assert out.shape == (N, NC), out.shape
    assert jnp.allclose(out, ref, atol=2e-2, rtol=2e-2), (out, ref)
    print("KERNEL_OK")
</pallas_src>

<mosaic_0001>
module attributes {stable_mosaic.version = 11 : i64} {
  func.func @_dummy_kernel(%arg0: i32, %arg1: memref<36x2048xbf16, #tpu.memory_space<vmem>>, %arg2: memref<8x36xbf16, #tpu.memory_space<vmem>>, %arg3: memref<8x1xf32, #tpu.memory_space<vmem>>, %arg4: memref<8x2048xf32, #tpu.memory_space<vmem>>, %arg5: memref<8x128xf32, #tpu.memory_space<vmem>>, %arg6: memref<1x128xf32, #tpu.memory_space<vmem>>, %arg7: memref<8x128xf32, #tpu.memory_space<vmem>>) attributes {dimension_semantics = [#tpu.dimension_semantics<parallel>], iteration_bounds = array<i64: 1>, scalar_prefetch = 0 : i64, scratch_operands = 0 : i64, tpu.core_type = #tpu.core_type<tc>, window_params = [{transform_indices = @transform_0, window_bounds = array<i64: 36, 2048>}, {pipeline_mode = #tpu.pipeline_mode<synchronous>, transform_indices = @transform_1, window_bounds = array<i64: 8, 36>}, {pipeline_mode = #tpu.pipeline_mode<synchronous>, transform_indices = @transform_2, window_bounds = array<i64: 8, 1>}, {pipeline_mode = #tpu.pipeline_mode<synchronous>, transform_indices = @transform_3, window_bounds = array<i64: 8, 2048>}, {pipeline_mode = #tpu.pipeline_mode<synchronous>, transform_indices = @transform_4, window_bounds = array<i64: 8, 128>}, {pipeline_mode = #tpu.pipeline_mode<synchronous>, transform_indices = @transform_5, window_bounds = array<i64: 1, 128>}, {transform_indices = @transform_6, window_bounds = array<i64: 8, 128>}]} {
    %c0 = arith.constant 0 : index
    %c0_0 = arith.constant 0 : index
    %0 = vector.load %arg2[%c0, %c0_0] : memref<8x36xbf16, #tpu.memory_space<vmem>>, vector<8x36xbf16>
    %c0_1 = arith.constant 0 : index
    %c0_2 = arith.constant 0 : index
    %1 = vector.load %arg1[%c0_1, %c0_2] : memref<36x2048xbf16, #tpu.memory_space<vmem>>, vector<36x2048xbf16>
    %cst = arith.constant dense<0.000000e+00> : vector<8x2048xf32>
    %2 = tpu.matmul %0, %1, %cst {dimension_numbers = #tpu.dot_dimension_numbers<[1], [0], [0], [1], [0, 0, 1, 1], [], []>} : vector<8x36xbf16>, vector<36x2048xbf16>, vector<8x2048xf32> -> vector<8x2048xf32>
    %c0_3 = arith.constant 0 : index
    %c0_4 = arith.constant 0 : index
    %3 = vector.load %arg3[%c0_3, %c0_4] : memref<8x1xf32, #tpu.memory_space<vmem>>, vector<8x1xf32>
    %4 = vector.broadcast %3 : vector<8x1xf32> to vector<8x2048xf32>
    %5 = arith.addf %2, %4 : vector<8x2048xf32>
    %cst_5 = arith.constant 0.000000e+00 : f32
    %6 = vector.broadcast %cst_5 : f32 to vector<8x2048xf32>
    %7 = arith.maximumf %5, %6 : vector<8x2048xf32>
    %c0_6 = arith.constant 0 : index
    %c0_7 = arith.constant 0 : index
    %8 = vector.load %arg4[%c0_6, %c0_7] : memref<8x2048xf32, #tpu.memory_space<vmem>>, vector<8x2048xf32>
    %cst_8 = arith.constant dense<0.000000e+00> : vector<8x8xf32>
    %9 = tpu.matmul %8, %7, %cst_8 {dimension_numbers = #tpu.dot_dimension_numbers<[1], [1], [0], [0], [0, 0, 1, 0], [], []>} : vector<8x2048xf32>, vector<8x2048xf32>, vector<8x8xf32> -> vector<8x8xf32>
    %c0_9 = arith.constant 0 : index
    %c0_10 = arith.constant 0 : index
    %10 = vector.load %arg5[%c0_9, %c0_10] : memref<8x128xf32, #tpu.memory_space<vmem>>, vector<8x128xf32>
    %cst_11 = arith.constant dense<0.000000e+00> : vector<8x128xf32>
    %11 = tpu.matmul %9, %10, %cst_11 {dimension_numbers = #tpu.dot_dimension_numbers<[1], [0], [0], [1], [0, 0, 1, 1], [], []>} : vector<8x8xf32>, vector<8x128xf32>, vector<8x128xf32> -> vector<8x128xf32>
    %c0_12 = arith.constant 0 : index
    %c0_13 = arith.constant 0 : index
    %12 = vector.load %arg6[%c0_12, %c0_13] : memref<1x128xf32, #tpu.memory_space<vmem>>, vector<1x128xf32>
    %13 = vector.broadcast %12 : vector<1x128xf32> to vector<8x128xf32>
    %14 = arith.addf %11, %13 : vector<8x128xf32>
    %c0_14 = arith.constant 0 : index
    %c0_15 = arith.constant 0 : index
    %15 = vector.load %arg7[%c0_14, %c0_15] : memref<8x128xf32, #tpu.memory_space<vmem>>, vector<8x128xf32>
    tpu.vector_store %arg7[%c0_14, %c0_15], %14 {strides = array<i32>} : memref<8x128xf32, #tpu.memory_space<vmem>>, vector<8x128xf32>,
    return
  }
  func.func @transform_0(%arg0: i32) -> (i32, i32) {
    %c0_i32 = arith.constant 0 : i32
    %c0_i32_0 = arith.constant 0 : i32
    return %c0_i32, %arg0 : i32, i32
  }
  func.func @transform_1(%arg0: i32) -> (i32, i32) {
    %c0_i32 = arith.constant 0 : i32
    %c0_i32_0 = arith.constant 0 : i32
    %c0_i32_1 = arith.constant 0 : i32
    return %c0_i32, %c0_i32_0 : i32, i32
  }
  func.func @transform_2(%arg0: i32) -> (i32, i32) {
    %c0_i32 = arith.constant 0 : i32
    %c0_i32_0 = arith.constant 0 : i32
    %c0_i32_1 = arith.constant 0 : i32
    return %c0_i32, %c0_i32_0 : i32, i32
  }
  func.func @transform_3(%arg0: i32) -> (i32, i32) {
    %c0_i32 = arith.constant 0 : i32
    %c0_i32_0 = arith.constant 0 : i32
    %c0_i32_1 = arith.constant 0 : i32
    return %c0_i32, %c0_i32_0 : i32, i32
  }
  func.func @transform_4(%arg0: i32) -> (i32, i32) {
    %c0_i32 = arith.constant 0 : i32
    %c0_i32_0 = arith.constant 0 : i32
    %c0_i32_1 = arith.constant 0 : i32
    return %c0_i32, %c0_i32_0 : i32, i32
  }
  func.func @transform_5(%arg0: i32) -> (i32, i32) {
    %c0_i32 = arith.constant 0 : i32
    %c0_i32_0 = arith.constant 0 : i32
    %c0_i32_1 = arith.constant 0 : i32
    return %c0_i32, %c0_i32_0 : i32, i32
  }
  func.func @transform_6(%arg0: i32) -> (i32, i32) {
    %c0_i32 = arith.constant 0 : i32
    %c0_i32_0 = arith.constant 0 : i32
    return %arg0, %c0_i32 : i32, i32
  }
}

</mosaic_0001>

<bundles_post_ra>
// kernel: tpu_custom_call.1
= control target key start
LH: loop header
LB: loop body
LE: loop exit
PB: predicated region body
PF: predicated region fallthrough
CT: control target
= control target key end

     0   :  { %11 = vsyncpa [#allocation3], 0  ;;  %s1395_s0 = inlined_call_operand.hbm [shape: bf16[36,2048], index: 0, kind: input, shape index: {}]   ;;  %s1396_s1 = inlined_call_operand.hbm [shape: bf16[8,36], index: 1, kind: input, shape index: {}]   ;;  %s1397_s2 = inlined_call_operand.vmem [shape: f32[8,1], index: 2, kind: input, shape index: {}]   ;;  %s1398_s3 = inlined_call_operand.hbm [shape: f32[8,2048], index: 3, kind: input, shape index: {}]   ;;  %s1399_s4 = inlined_call_operand.vmem [shape: f32[8,128], index: 4, kind: input, shape index: {}]   ;;  %s1400_s5 = inlined_call_operand.vmem [shape: f32[1,128], index: 5, kind: input, shape index: {}]   ;;  %s1401_s6 = inlined_call_operand.hbm [shape: f32[8,128], index: 6, kind: output, shape index: {}]  }
   0x1   :  { %12 = vsyncpa [#allocation6], 0  ;;  %s32_s23 = sshll.u32 %s1396_s1, 4  ;;  %s33_s23 = int_to_ptr.hbm [resolvable:$true] %s32_s23 }
   0x2   :  { %13 = vsyncpa [#allocation4], 0  ;;  %s1264_s24 = smov [#allocation5]   ;;  %s18_s28 = sshll.u32 %s1395_s0, 4  ;;  %s19_s28 = int_to_ptr.hbm [resolvable:$true] %s18_s28 }
   0x3   :  { %s34_s25 = sshll.u32 %s1264_s24, 4  ;;  %s1265_s29 = smov [#allocation2]   ;;  %s35_s25 = int_to_ptr.vmem [resolvable:$true] %s34_s25 }
   0x4   :  { %37 = dma.hbm_to_vmem [thread:$0]  %s33_s23, 64, %s35_s25, [#allocation6]  }
   0x5   :  { %s20_s30 = sshll.u32 %s1265_s29, 4  ;;  %s1266_s7 = smov 1024   ;;  %s21_s30 = int_to_ptr.vmem [resolvable:$true] %s20_s30 }
   0x6   :  { %s1267_s8 = smov 64   ;;  %s45_s1 = sshll.u32 %s1398_s3, 4  ;;  %s46_s1 = int_to_ptr.hbm [resolvable:$true] %s45_s1 }
   0x7   :  { %26 = dma.hbm_to_vmem [thread:$0]  %s19_s28, 5120, %s21_s30, [#allocation3], %s1266_s7, %s1266_s7, %s1267_s8  }
   0x8   :  { %s1268_s11 = smov [#allocation7]  }
   0x9   :  { %s47_s12 = sshll.u32 %s1268_s11, 4  ;;  %s48_s12 = int_to_ptr.vmem [resolvable:$true] %s47_s12 }
   0xa   :  { %50 = dma.hbm_to_vmem [thread:$0]  %s46_s1, 2048, %s48_s12, [#allocation6]  }
   0xb   :  { %1258 = dma.done.wait [#allocation3], 5120  }
   0xc   :  { %1259 = vsyncadd [#allocation3], 4294962176 }
   0xd   :  { %1260 = dma.done.wait [#allocation6], 2112  }
   0xe   :  { %1261 = vsyncadd [#allocation6], 4294965184  ;;  %v1269_v0 = vmov 0   ;;  %v101_v1 = vld [vmem:[#allocation2 + $0x100] sm:$0x33]  ;;  %vm319_vm0 = vcmask 1041408  }
   0xf   :  { %1160 = vset.pattern.permute.xlu0 %v1269_v0  ;;  %v102_v2 = vld [vmem:[#allocation2 + $0x108] sm:$0x33]  ;;  %v219_v3 = vunpack.c.l.b16 %v101_v1  ;;  %v220_v4 = vunpack.c.h.b16 %v101_v1  ;;  %v1042_v7 = vld [vmem:[#allocation2 + $0x80] sm:$0xf]  ;;  %v1137_v13 = vld [vmem:[#allocation2 + $0x84] sm:$0xf] }
  0x10   :  { %v221_v5 = vunpack.c.l.b16 %v102_v2  ;;  %v222_v6 = vunpack.c.h.b16 %v102_v2  ;;  %v1145_v8 = vld [vmem:[#allocation2 + $0xbc] sm:$0xf0]  ;;  %v1044_v14 = vld [vmem:[#allocation2 + $0xc0] sm:$0xf0]  ;;  %v1050_v15 = vld [vmem:[#allocation2 + $0x88] sm:$0xf] }
  0x11   :  { %v267_v9 = vpack.c.b16 %v219_v3, %v219_v3  ;;  %v268_v10 = vpack.c.b16 %v220_v4, %v220_v4  ;;  %v1146_v16 = vld [vmem:[#allocation2 + $0xc4] sm:$0xf0]  ;;  %v1138_v17 = vld [vmem:[#allocation2 + $0x8c] sm:$0xf]  ;;  %v978_v23 = vld [vmem:[#allocation2] sm:$0xf]  ;;  %v1043_v24 = vor.u32 %v1145_v8, %v1042_v7  ;;  %v1047_v25 = vor.u32 %v1137_v13, %v1044_v14 }
  0x12   :  { %v269_v11 = vpack.c.b16 %v221_v5, %v221_v5  ;;  %v270_v12 = vpack.c.b16 %v222_v6, %v222_v6  ;;  %v1052_v18 = vld [vmem:[#allocation2 + $0xc8] sm:$0xf0]  ;;  %v1129_v26 = vld [vmem:[#allocation2 + $0x3c] sm:$0xf0]  ;;  %v1121_v27 = vld [vmem:[#allocation2 + $0x4] sm:$0xf]  ;;  %v1051_v29 = vor.u32 %v1146_v16, %v1050_v15 }
  0x13   :  { %v321_v19 = vsel %vm319_vm0, %v267_v9, 0  ;;  %v324_v20 = vsel %vm319_vm0, %v268_v10, 0  ;;  %v980_v28 = vld [vmem:[#allocation2 + $0x40] sm:$0xf0]  ;;  %v1055_v30 = vor.u32 %v1138_v17, %v1052_v18  ;;  %v986_v31 = vld [vmem:[#allocation2 + $0x8] sm:$0xf]  ;;  %v979_v41 = vor.u32 %v1129_v26, %v978_v23 }
  0x14   :  { %v327_v21 = vsel %vm319_vm0, %v269_v11, 0  ;;  %v330_v22 = vsel %vm319_vm0, %v270_v12, 0  ;;  %373 = vmatpush.bf16.msra.mxu0 %v321_v19  ;;  %386 = vmatpush.bf16.msra.mxu1 %v324_v20  ;;  %v103_v32 = vld [vmem:[#allocation2 + $0x110] sm:$0x33]  ;;  %v104_v33 = vld [vmem:[#allocation2 + $0x118] sm:$0x33]  ;;  %v983_v42 = vor.u32 %v1121_v27, %v980_v28 }
  0x15   :  { %399 = vmatpush.bf16.msra.mxu2 %v327_v21  ;;  %412 = vmatpush.bf16.msra.mxu3 %v330_v22  ;;  %v1130_v34 = vld [vmem:[#allocation2 + $0x44] sm:$0xf0]  ;;  %v1122_v35 = vld [vmem:[#allocation2 + $0xc] sm:$0xf]  ;;  %v223_v37 = vunpack.c.l.b16 %v103_v32  ;;  %v224_v38 = vunpack.c.h.b16 %v103_v32  ;;  %v225_v39 = vunpack.c.l.b16 %v104_v33  ;;  %v226_v40 = vunpack.c.h.b16 %v104_v33  ;;  %v1058_v49 = vld [vmem:[#allocation2 + $0x90] sm:$0xf] }
  0x16   :  { %v988_v36 = vld [vmem:[#allocation2 + $0x48] sm:$0xf0]  ;;  %v987_v45 = vor.u32 %v1130_v34, %v986_v31  ;;  %vm315_vm1 = vcmask 293888   ;;  %v1147_v50 = vld [vmem:[#allocation2 + $0xcc] sm:$0xf0]  ;;  %v109_v51 = vld [vmem:[%s1397_s2] sm:$0xff] }
  0x17   :  { %v271_v43 = vpack.c.b16 %v223_v37, %v223_v37  ;;  %v272_v44 = vpack.c.b16 %v224_v38, %v224_v38  ;;  %v991_v46 = vor.u32 %v1122_v35, %v988_v36  ;;  %v273_v47 = vpack.c.b16 %v225_v39, %v225_v39  ;;  %v1139_v54 = vld [vmem:[#allocation2 + $0x94] sm:$0xf]  ;;  %112 = vperm.xlu0 %1160, %v109_v51   ;;  %v1324_v56 = vld [vmem:[#allocation5] sm:$0xf]  ;;  %v106_v58 = vld [vmem:[#allocation2 + $0x128] sm:$0x33] }
  0x18   :  { %374 = vmatpush.bf16.msra.mxu0 %v1043_v24  ;;  %387 = vmatpush.bf16.msra.mxu1 %v1047_v25  ;;  %v274_v48 = vpack.c.b16 %v226_v40, %v226_v40  ;;  %v1060_v55 = vld [vmem:[#allocation2 + $0xd0] sm:$0xf0]  ;;  %v105_v57 = vld [vmem:[#allocation2 + $0x120] sm:$0x33]  ;;  %v1066_v59 = vld [vmem:[#allocation2 + $0x98] sm:$0xf]  ;;  %v1059_v2 = vor.u32 %v1147_v50, %v1058_v49  ;;  %v229_v9 = vunpack.c.l.b16 %v106_v58  ;;  %v230_v10 = vunpack.c.h.b16 %v106_v58 }
  0x19   :  { %400 = vmatpush.bf16.msra.mxu2 %v1051_v29  ;;  %413 = vmatpush.bf16.msra.mxu3 %v1055_v30  ;;  %v333_v52 = vsel %vm319_vm0, %v271_v43, 0  ;;  %v336_v53 = vsel %vm319_vm0, %v272_v44, 0  ;;  %v1148_v60 = vld [vmem:[#allocation2 + $0xd4] sm:$0xf0]  ;;  %v1140_v61 = vld [vmem:[#allocation2 + $0x9c] sm:$0xf]  ;;  %v227_v62 = vunpack.c.l.b16 %v105_v57  ;;  %v228_v63 = vunpack.c.h.b16 %v105_v57 }
  0x1a   :  { %v339_v0 = vsel %vm319_vm0, %v273_v47, 0  ;;  %v342_v1 = vsel %vm319_vm0, %v274_v48, 0  ;;  %v1063_v3 = vor.u32 %v1139_v54, %v1060_v55  ;;  %v1068_v4 = vld [vmem:[#allocation2 + $0xd8] sm:$0xf0]  ;;  %v994_v5 = vld [vmem:[#allocation2 + $0x10] sm:$0xf]  ;;  %v1067_v13 = vor.u32 %v1148_v60, %v1066_v59 }
  0x1b   :  { %v1131_v6 = vld [vmem:[#allocation2 + $0x4c] sm:$0xf0]  ;;  %v1123_v7 = vld [vmem:[#allocation2 + $0x14] sm:$0xf]  ;;  %v275_v11 = vpack.c.b16 %v227_v62, %v227_v62  ;;  %v276_v12 = vpack.c.b16 %v228_v63, %v228_v63  ;;  %v1071_v14 = vor.u32 %v1140_v61, %v1068_v4  ;;  %v1002_v15 = vld [vmem:[#allocation2 + $0x18] sm:$0xf]  ;;  %v277_v21 = vpack.c.b16 %v229_v9, %v229_v9 }
  0x1c   :  { %375 = vmatpush.bf16.msra.mxu0 %v979_v41  ;;  %388 = vmatpush.bf16.msra.mxu1 %v983_v42  ;;  %v996_v8 = vld [vmem:[#allocation2 + $0x50] sm:$0xf0]  ;;  %v995_v16 = vor.u32 %v1131_v6, %v994_v5  ;;  %v1132_v18 = vld [vmem:[#allocation2 + $0x54] sm:$0xf0]  ;;  %v1124_v19 = vld [vmem:[#allocation2 + $0x1c] sm:$0xf]  ;;  %v278_v22 = vpack.c.b16 %v230_v10, %v230_v10 }
  0x1d   :  { %401 = vmatpush.bf16.msra.mxu2 %v987_v45  ;;  %414 = vmatpush.bf16.msra.mxu3 %v991_v46  ;;  %v999_v17 = vor.u32 %v1123_v7, %v996_v8  ;;  %v1004_v20 = vld [vmem:[#allocation2 + $0x58] sm:$0xf0]  ;;  %v1074_v23 = vld [vmem:[#allocation2 + $0xa0] sm:$0xf]  ;;  %v345_v25 = vsel %vm319_vm0, %v275_v11, 0  ;;  %v348_v26 = vsel %vm319_vm0, %v276_v12, 0  ;;  %v1003_v29 = vor.u32 %v1132_v18, %v1002_v15 }
  0x1e   :  { %v1149_v24 = vld [vmem:[#allocation2 + $0xdc] sm:$0xf0]  ;;  %v1141_v27 = vld [vmem:[#allocation2 + $0xa4] sm:$0xf]  ;;  %v1007_v30 = vor.u32 %v1124_v19, %v1004_v20  ;;  %v107_v31 = vld [vmem:[#allocation2 + $0x130] sm:$0x33] }
  0x1f   :  { %1104 = vmatmul.msk.bf16.vlgmr.msra.gmra.mxu0 %vm315_vm1, %v1324_v56  ;;  %1105 = vmatmul.msk.bf16.vlgmr.msra.gmra.mxu1 %vm315_vm1, %v1324_v56  ;;  %v1076_v28 = vld [vmem:[#allocation2 + $0xe0] sm:$0xf0]  ;;  %v1082_v32 = vld [vmem:[#allocation2 + $0xa8] sm:$0xf]  ;;  %v108_v34 = vld [vmem:[#allocation2 + $0x138] sm:$0x33]  ;;  %v1075_v37 = vor.u32 %v1149_v24, %v1074_v23  ;;  %v231_v41 = vunpack.c.l.b16 %v107_v31  ;;  %v232_v42 = vunpack.c.h.b16 %v107_v31 }
  0x20   :  { %425 = vmatpush.bf16.msrb.mxu0 %v333_v52  ;;  %438 = vmatpush.bf16.msrb.mxu1 %v336_v53  ;;  %v1150_v33 = vld [vmem:[#allocation2 + $0xe4] sm:$0xf0]  ;;  %v351_v35 = vsel %vm319_vm0, %v277_v21, 0  ;;  %v354_v36 = vsel %vm319_vm0, %v278_v22, 0  ;;  %v1079_v38 = vor.u32 %v1141_v27, %v1076_v28  ;;  %v1142_v39 = vld [vmem:[#allocation2 + $0xac] sm:$0xf]  ;;  %v233_v46 = vunpack.c.l.b16 %v108_v34 }
  0x21   :  { %1106 = vmatmul.msk.bf16.vlgmr.msra.gmra.mxu2 %vm315_vm1, %v1324_v56  ;;  %1107 = vmatmul.msk.bf16.vlgmr.msra.gmra.mxu3 %vm315_vm1, %v1324_v56  ;;  %v1084_v40 = vld [vmem:[#allocation2 + $0xe8] sm:$0xf0]  ;;  %v1010_v43 = vld [vmem:[#allocation2 + $0x20] sm:$0xf]  ;;  %v1125_v45 = vld [vmem:[#allocation2 + $0x24] sm:$0xf]  ;;  %v234_v47 = vunpack.c.h.b16 %v108_v34  ;;  %v1083_v48 = vor.u32 %v1150_v33, %v1082_v32  ;;  %v279_v55 = vpack.c.b16 %v231_v41, %v231_v41  ;;  %v280_v57 = vpack.c.b16 %v232_v42, %v232_v42 }
  0x22   :  { %451 = vmatpush.bf16.msrb.mxu2 %v339_v0  ;;  %464 = vmatpush.bf16.msrb.mxu3 %v342_v1  ;;  %v1133_v44 = vld [vmem:[#allocation2 + $0x5c] sm:$0xf0]  ;;  %v1087_v49 = vor.u32 %v1142_v39, %v1084_v40  ;;  %v1012_v50 = vld [vmem:[#allocation2 + $0x60] sm:$0xf0]  ;;  %v1018_v51 = vld [vmem:[#allocation2 + $0x28] sm:$0xf]  ;;  %v281_v60 = vpack.c.b16 %v233_v46, %v233_v46 }
  0x23   :  { %v1134_v52 = vld [vmem:[#allocation2 + $0x64] sm:$0xf0]  ;;  %v1126_v53 = vld [vmem:[#allocation2 + $0x2c] sm:$0xf]  ;;  %v1011_v58 = vor.u32 %v1133_v44, %v1010_v43  ;;  %v1015_v59 = vor.u32 %v1125_v45, %v1012_v50  ;;  %v282_v61 = vpack.c.b16 %v234_v47, %v234_v47  ;;  %v1090_v0 = vld [vmem:[#allocation2 + $0xb0] sm:$0xf] }
  0x24   :  { %426 = vmatpush.bf16.msrb.mxu0 %v1059_v2  ;;  %439 = vmatpush.bf16.msrb.mxu1 %v1063_v3  ;;  %v1020_v54 = vld [vmem:[#allocation2 + $0x68] sm:$0xf0]  ;;  %v1019_v62 = vor.u32 %v1134_v52, %v1018_v51  ;;  %v1151_v1 = vld [vmem:[#allocation2 + $0xec] sm:$0xf0]  ;;  %v1143_v2 = vld [vmem:[#allocation2 + $0xb4] sm:$0xf] }
  0x25   :  { %v1023_v63 = vor.u32 %v1126_v53, %v1020_v54  ;;  %v1092_v3 = vld [vmem:[#allocation2 + $0xf0] sm:$0xf0]  ;;  %v357_v4 = vsel %vm319_vm0, %v279_v55, 0  ;;  %v360_v5 = vsel %vm319_vm0, %v280_v57, 0  ;;  %v1098_v6 = vld [vmem:[#allocation2 + $0xb8] sm:$0xf]  ;;  %v1091_v12 = vor.u32 %v1151_v1, %v1090_v0 }
  0x26   :  { %452 = vmatpush.bf16.msrb.mxu2 %v1067_v13  ;;  %465 = vmatpush.bf16.msrb.mxu3 %v1071_v14  ;;  %v1152_v7 = vld [vmem:[#allocation2 + $0xf4] sm:$0xf0]  ;;  %v363_v8 = vsel %vm319_vm0, %v281_v60, 0  ;;  %v366_v9 = vsel %vm319_vm0, %v282_v61, 0  ;;  %v1144_v10 = vld [vmem:[#allocation2 + $0xbc] sm:$0xf]  ;;  %v1095_v13 = vor.u32 %v1143_v2, %v1092_v3 }
  0x27   :  { %v1100_v11 = vld [vmem:[#allocation2 + $0xf8] sm:$0xf0]  ;;  %v1026_v14 = vld [vmem:[#allocation2 + $0x30] sm:$0xf]  ;;  %v1127_v18 = vld [vmem:[#allocation2 + $0x34] sm:$0xf] }
  0x28   :  { %427 = vmatpush.bf16.msrb.mxu0 %v995_v16  ;;  %440 = vmatpush.bf16.msrb.mxu1 %v999_v17  ;;  %v1135_v15 = vld [vmem:[#allocation2 + $0x6c] sm:$0xf0]  ;;  %v1099_v16 = vor.u32 %v1152_v7, %v1098_v6  ;;  %v1103_v17 = vor.u32 %v1144_v10, %v1100_v11  ;;  %v1028_v19 = vld [vmem:[#allocation2 + $0x70] sm:$0xf0]  ;;  %v1034_v20 = vld [vmem:[#allocation2 + $0x38] sm:$0xf] }
  0x29   :  { %v1136_v21 = vld [vmem:[#allocation2 + $0x74] sm:$0xf0]  ;;  %v1128_v22 = vld [vmem:[#allocation2 + $0x3c] sm:$0xf]  ;;  %v1027_v24 = vor.u32 %v1135_v15, %v1026_v14  ;;  %v596_v54 = vld [vmem:[#allocation7 + $0x20] sm:$0xff]  ;;  %vm933_vm2 = vcmask 64512  }
  0x2a   :  { %453 = vmatpush.bf16.msrb.mxu2 %v1003_v29  ;;  %466 = vmatpush.bf16.msrb.mxu3 %v1007_v30  ;;  %v1036_v23 = vld [vmem:[#allocation2 + $0x78] sm:$0xf0]  ;;  %v594_v44 = vld [vmem:[#allocation7 + $0x10] sm:$0xff]  ;;  %v597_v55 = vld [vmem:[#allocation7 + $0x28] sm:$0xff]  ;;  %s1270_s15 = smov [#allocation8]   ;;  %s965_s19 = sshll.u32 %s1401_s6, 4  ;;  %s966_s19 = int_to_ptr.hbm [resolvable:$true] %s965_s19 }
  0x2b   :  { %v1039_v27 = vor.u32 %v1128_v22, %v1036_v23  ;;  %v595_v45 = vld [vmem:[#allocation7 + $0x18] sm:$0xff]  ;;  %v598_v1 = vld [vmem:[#allocation7 + $0x30] sm:$0xff]  ;;  %v600_v11 = vld [vmem:[#allocation7 + $0x40] sm:$0xff]  ;;  %s963_s16 = sshll.u32 %s1270_s15, 4  ;;  %s964_s16 = int_to_ptr.vmem [resolvable:$true] %s963_s16 }
  0x2c   :  { %477 = vmatpush.bf16.msra.mxu0 %v345_v25  ;;  %490 = vmatpush.bf16.msra.mxu1 %v348_v26  ;;  %v1031_v25 = vor.u32 %v1127_v18, %v1028_v19  ;;  %v1035_v26 = vor.u32 %v1136_v21, %v1034_v20  ;;  %v599_v2 = vld [vmem:[#allocation7 + $0x38] sm:$0xff]  ;;  %v602_v21 = vld [vmem:[#allocation7 + $0x50] sm:$0xff] }
  0x2d   :  { %v603_v22 = vld [vmem:[#allocation7 + $0x58] sm:$0xff] }
  0x2e   :  { %503 = vmatpush.bf16.msra.mxu2 %v351_v35  ;;  %516 = vmatpush.bf16.msra.mxu3 %v354_v36  ;;  %v592_v35 = vld [vmem:[#allocation7] sm:$0xff]  ;;  %v593_v36 = vld [vmem:[#allocation7 + $0x8] sm:$0xff] }
  0x2f   :  { %1108 = vmatmul.msk.bf16.vlgmr.msrb.gmra.mxu0 %vm315_vm1, %v1324_v56  ;;  %1109 = vmatmul.msk.bf16.vlgmr.msrb.gmra.mxu1 %vm315_vm1, %v1324_v56 }
  0x30   :  { %478 = vmatpush.bf16.msra.mxu0 %v1075_v37  ;;  %491 = vmatpush.bf16.msra.mxu1 %v1079_v38 }
  0x31   :  { %1110 = vmatmul.msk.bf16.vlgmr.msrb.gmra.mxu2 %vm315_vm1, %v1324_v56  ;;  %1111 = vmatmul.msk.bf16.vlgmr.msrb.gmra.mxu3 %vm315_vm1, %v1324_v56 }
  0x32   :  { %504 = vmatpush.bf16.msra.mxu2 %v1083_v48  ;;  %517 = vmatpush.bf16.msra.mxu3 %v1087_v49 }
  0x34   :  { %479 = vmatpush.bf16.msra.mxu0 %v1011_v58  ;;  %492 = vmatpush.bf16.msra.mxu1 %v1015_v59 }
  0x36   :  { %505 = vmatpush.bf16.msra.mxu2 %v1019_v62  ;;  %518 = vmatpush.bf16.msra.mxu3 %v1023_v63 }
  0x38   :  { %529 = vmatpush.bf16.msrb.mxu0 %v357_v4  ;;  %542 = vmatpush.bf16.msrb.mxu1 %v360_v5 }
  0x3a   :  { %555 = vmatpush.bf16.msrb.mxu2 %v363_v8  ;;  %568 = vmatpush.bf16.msrb.mxu3 %v366_v9 }
  0x3c   :  { %530 = vmatpush.bf16.msrb.mxu0 %v1091_v12  ;;  %543 = vmatpush.bf16.msrb.mxu1 %v1095_v13  ;;  %v601_v12 = vld [vmem:[#allocation7 + $0x48] sm:$0xff] }
  0x3e   :  { %556 = vmatpush.bf16.msrb.mxu2 %v1099_v16  ;;  %569 = vmatpush.bf16.msrb.mxu3 %v1103_v17 }
  0x3f   :  { %1112 = vmatmul.msk.bf16.vlgmr.msra.gmra.mxu0 %vm315_vm1, %v1324_v56  ;;  %1113 = vmatmul.msk.bf16.vlgmr.msra.gmra.mxu1 %vm315_vm1, %v1324_v56 }
  0x40   :  { %531 = vmatpush.bf16.msrb.mxu0 %v1027_v24  ;;  %544 = vmatpush.bf16.msrb.mxu1 %v1031_v25 }
  0x41   :  { %1114 = vmatmul.msk.bf16.vlgmr.msra.gmra.mxu2 %vm315_vm1, %v1324_v56  ;;  %1115 = vmatmul.msk.bf16.vlgmr.msra.gmra.mxu3 %vm315_vm1, %v1324_v56 }
  0x42   :  { %557 = vmatpush.bf16.msrb.mxu2 %v1035_v26  ;;  %570 = vmatpush.bf16.msrb.mxu3 %v1039_v27 }
  0x4f   :  { %1116 = vmatmul.msk.bf16.vlgmr.msrb.gmra.mxu0 %vm315_vm1, %v1324_v56  ;;  %1117 = vmatmul.msk.bf16.vlgmr.msrb.gmra.mxu1 %vm315_vm1, %v1324_v56 }
  0x51   :  { %1118 = vmatmul.msk.bf16.vlgmr.msrb.gmra.mxu2 %vm315_vm1, %v1324_v56  ;;  %1119 = vmatmul.msk.bf16.vlgmr.msrb.gmra.mxu3 %vm315_vm1, %v1324_v56 }
  0x89   :  { %v1368_v28 = vpop.permute.xlu0 %112 }
  0x9c   :  { %v377_v29 = vpop.f32.mrf.mxu0  ;;  %v390_v30 = vpop.f32.mrf.mxu1 }
  0x9d   :  { %v378_v31 = vadd.f32 %v377_v29, %v1368_v28  ;;  %v391_v32 = vadd.f32 %v390_v30, %v1368_v28 }
  0x9f   :  { %v576_v33 = vmax.f32 %v378_v31, 0.0  ;;  %v577_v34 = vmax.f32 %v391_v32, 0.0  ;;  %v604_v32 = vld [vmem:[#allocation7 + $0x60] sm:$0xff] }
  0xa1   :  { %623 = vmatpush.xpose.msra.mxu0 %v576_v33  ;;  %643 = vmatpush.xpose.msra.mxu1 %v577_v34  ;;  %v605_v33 = vld [vmem:[#allocation7 + $0x68] sm:$0xff] }
  0xa4   :  { %v403_v37 = vpop.f32.mrf.mxu2  ;;  %v416_v38 = vpop.f32.mrf.mxu3  ;;  %624 = vmatmul.f32.vlgmr.msra.gmra.mxu0 %v592_v35  ;;  %644 = vmatmul.f32.vlgmr.msra.gmra.mxu1 %v593_v36 }
  0xa5   :  { %v404_v39 = vadd.f32 %v403_v37, %v1368_v28  ;;  %v417_v56 = vadd.f32 %v416_v38, %v1368_v28  ;;  %v379_v40 = vpop.f32.mrf.mxu0  ;;  %v392_v41 = vpop.f32.mrf.mxu1 }
  0xa6   :  { %v606_v41 = vld [vmem:[#allocation7 + $0x70] sm:$0xff] }
  0xa7   :  { %v578_v42 = vmax.f32 %v404_v39, 0.0  ;;  %v579_v43 = vmax.f32 %v417_v56, 0.0 }
  0xa9   :  { %663 = vmatpush.xpose.msra.mxu2 %v578_v42  ;;  %683 = vmatpush.xpose.msra.mxu3 %v579_v43  ;;  %v607_v42 = vld [vmem:[#allocation7 + $0x78] sm:$0xff] }
  0xac   :  { %v405_v46 = vpop.f32.mrf.mxu2  ;;  %v418_v47 = vpop.f32.mrf.mxu3  ;;  %664 = vmatmul.f32.vlgmr.msra.gmra.mxu2 %v594_v44  ;;  %684 = vmatmul.f32.vlgmr.msra.gmra.mxu3 %v595_v45 }
  0xad   :  { %v429_v48 = vpop.f32.mrf.mxu0  ;;  %v442_v49 = vpop.f32.mrf.mxu1 }
  0xae   :  { %v430_v50 = vadd.f32 %v429_v48, %v1368_v28  ;;  %v443_v51 = vadd.f32 %v442_v49, %v1368_v28 }
  0xb0   :  { %v580_v52 = vmax.f32 %v430_v50, 0.0  ;;  %v581_v53 = vmax.f32 %v443_v51, 0.0  ;;  %v928_v51 = vld [vmem:[%s1399_s4] sm:$0xff] }
  0xb2   :  { %703 = vmatpush.xpose.msrb.mxu0 %v580_v52  ;;  %723 = vmatpush.xpose.msrb.mxu1 %v581_v53 }
  0xb4   :  { %v455_v57 = vpop.f32.mrf.mxu2  ;;  %v468_v58 = vpop.f32.mrf.mxu3 }
  0xb5   :  { %v456_v59 = vadd.f32 %v455_v57, %v1368_v28  ;;  %v469_v60 = vadd.f32 %v468_v58, %v1368_v28  ;;  %v431_v61 = vpop.f32.mrf.mxu0  ;;  %v444_v62 = vpop.f32.mrf.mxu1  ;;  %704 = vmatmul.f32.vlgmr.msrb.gmra.mxu0 %v596_v54  ;;  %724 = vmatmul.f32.vlgmr.msrb.gmra.mxu1 %v597_v55 }
  0xb7   :  { %v582_v63 = vmax.f32 %v456_v59, 0.0  ;;  %v583_v0 = vmax.f32 %v469_v60, 0.0 }
  0xb9   :  { %743 = vmatpush.xpose.msrb.mxu2 %v582_v63  ;;  %763 = vmatpush.xpose.msrb.mxu3 %v583_v0 }
  0xbc   :  { %v457_v3 = vpop.f32.mrf.mxu2  ;;  %v470_v4 = vpop.f32.mrf.mxu3  ;;  %744 = vmatmul.f32.vlgmr.msrb.gmra.mxu2 %v598_v1  ;;  %764 = vmatmul.f32.vlgmr.msrb.gmra.mxu3 %v599_v2 }
  0xbd   :  { %v481_v5 = vpop.f32.mrf.mxu0  ;;  %v494_v6 = vpop.f32.mrf.mxu1 }
  0xbe   :  { %v482_v7 = vadd.f32 %v481_v5, %v1368_v28  ;;  %v495_v8 = vadd.f32 %v494_v6, %v1368_v28 }
  0xc0   :  { %v584_v9 = vmax.f32 %v482_v7, 0.0  ;;  %v585_v10 = vmax.f32 %v495_v8, 0.0 }
  0xc2   :  { %783 = vmatpush.xpose.msra.mxu0 %v584_v9  ;;  %803 = vmatpush.xpose.msra.mxu1 %v585_v10 }
  0xc4   :  { %v507_v13 = vpop.f32.mrf.mxu2  ;;  %v520_v14 = vpop.f32.mrf.mxu3 }
  0xc5   :  { %v508_v15 = vadd.f32 %v507_v13, %v1368_v28  ;;  %v521_v16 = vadd.f32 %v520_v14, %v1368_v28  ;;  %v483_v17 = vpop.f32.mrf.mxu0  ;;  %v496_v18 = vpop.f32.mrf.mxu1  ;;  %784 = vmatmul.f32.vlgmr.msra.gmra.mxu0 %v600_v11  ;;  %804 = vmatmul.f32.vlgmr.msra.gmra.mxu1 %v601_v12  ;;  %v1161_v13 = vld [vmem:[%s1400_s5] ss:$0 sm:$0xff] }
  0xc7   :  { %v586_v19 = vmax.f32 %v508_v15, 0.0  ;;  %v587_v20 = vmax.f32 %v521_v16, 0.0 }
  0xc9   :  { %823 = vmatpush.xpose.msra.mxu2 %v586_v19  ;;  %843 = vmatpush.xpose.msra.mxu3 %v587_v20 }
  0xcc   :  { %v509_v23 = vpop.f32.mrf.mxu2  ;;  %v522_v24 = vpop.f32.mrf.mxu3  ;;  %824 = vmatmul.f32.vlgmr.msra.gmra.mxu2 %v602_v21  ;;  %844 = vmatmul.f32.vlgmr.msra.gmra.mxu3 %v603_v22 }
  0xcd   :  { %v533_v25 = vpop.f32.mrf.mxu0  ;;  %v546_v26 = vpop.f32.mrf.mxu1 }
  0xce   :  { %v534_v27 = vadd.f32 %v533_v25, %v1368_v28  ;;  %v547_v29 = vadd.f32 %v546_v26, %v1368_v28 }
  0xd0   :  { %v588_v30 = vmax.f32 %v534_v27, 0.0  ;;  %v589_v31 = vmax.f32 %v547_v29, 0.0 }
  0xd2   :  { %863 = vmatpush.xpose.msrb.mxu0 %v588_v30  ;;  %883 = vmatpush.xpose.msrb.mxu1 %v589_v31 }
  0xd4   :  { %v559_v34 = vpop.f32.mrf.mxu2  ;;  %v572_v35 = vpop.f32.mrf.mxu3 }
  0xd5   :  { %v560_v36 = vadd.f32 %v559_v34, %v1368_v28  ;;  %v573_v37 = vadd.f32 %v572_v35, %v1368_v28  ;;  %v535_v38 = vpop.f32.mrf.mxu0  ;;  %v548_v39 = vpop.f32.mrf.mxu1  ;;  %864 = vmatmul.f32.vlgmr.msrb.gmra.mxu0 %v604_v32  ;;  %884 = vmatmul.f32.vlgmr.msrb.gmra.mxu1 %v605_v33 }
  0xd6   :  { %952 = vmatpush.msra.mxu0 %v928_v51 }
  0xd7   :  { %v590_v56 = vmax.f32 %v560_v36, 0.0  ;;  %v591_v40 = vmax.f32 %v573_v37, 0.0 }
  0xd9   :  { %903 = vmatpush.xpose.msrb.mxu2 %v590_v56  ;;  %923 = vmatpush.xpose.msrb.mxu3 %v591_v40 }
  0xdc   :  { %v561_v43 = vpop.f32.mrf.mxu2  ;;  %v574_v44 = vpop.f32.mrf.mxu3  ;;  %904 = vmatmul.f32.vlgmr.msrb.gmra.mxu2 %v606_v41  ;;  %924 = vmatmul.f32.vlgmr.msrb.gmra.mxu3 %v607_v42 }
 0x121   :  { %v645_v45 = vpop.f32.mrf.mxu1  ;;  %v625_v46 = vpop.f32.mrf.mxu0 }
 0x122   :  { %v646_v47 = vadd.f32 %v645_v45, %v625_v46 }
 0x12f   :  { %v665_v48 = vpop.f32.mrf.mxu2  ;;  %v685_v28 = vpop.f32.mrf.mxu3 }
 0x130   :  { %v666_v49 = vadd.f32 %v665_v48, %v646_v47 }
 0x132   :  { %v686_v50 = vadd.f32 %v685_v28, %v666_v49  ;;  %v705_v52 = vpop.f32.mrf.mxu0  ;;  %v725_v54 = vpop.f32.mrf.mxu1 }
 0x134   :  { %v706_v53 = vadd.f32 %v705_v52, %v686_v50 }
 0x136   :  { %v726_v55 = vadd.f32 %v725_v54, %v706_v53 }
 0x13f   :  { %v745_v57 = vpop.f32.mrf.mxu2  ;;  %v765_v59 = vpop.f32.mrf.mxu3 }
 0x140   :  { %v746_v58 = vadd.f32 %v745_v57, %v726_v55 }
 0x142   :  { %v766_v60 = vadd.f32 %v765_v59, %v746_v58  ;;  %v785_v61 = vpop.f32.mrf.mxu0  ;;  %v805_v63 = vpop.f32.mrf.mxu1 }
 0x144   :  { %v786_v62 = vadd.f32 %v785_v61, %v766_v60 }
 0x146   :  { %v806_v0 = vadd.f32 %v805_v63, %v786_v62 }
 0x14f   :  { %v825_v1 = vpop.f32.mrf.mxu2  ;;  %v845_v3 = vpop.f32.mrf.mxu3 }
 0x150   :  { %v826_v2 = vadd.f32 %v825_v1, %v806_v0 }
 0x152   :  { %v846_v4 = vadd.f32 %v845_v3, %v826_v2  ;;  %v865_v5 = vpop.f32.mrf.mxu0  ;;  %v885_v7 = vpop.f32.mrf.mxu1 }
 0x154   :  { %v866_v6 = vadd.f32 %v865_v5, %v846_v4 }
 0x156   :  { %v886_v8 = vadd.f32 %v885_v7, %v866_v6 }
 0x15f   :  { %v905_v9 = vpop.f32.mrf.mxu2  ;;  %v925_v10 = vpop.f32.mrf.mxu3 }
 0x160   :  { %v906_v11 = vadd.f32 %v905_v9, %v886_v8 }
 0x162   :  { %v926_v12 = vadd.f32 %v925_v10, %v906_v11 }
 0x164   :  { %1120 = vmatmul.msk.f32.vlgmr.msra.gmra.mxu0 %vm933_vm2, %v926_v12 }
 0x1e1   :  { %v954_v14 = vpop.f32.mrf.mxu0 }
 0x1e2   :  { %v955_v15 = vadd.f32 %v1161_v13, %v954_v14 }
 0x1e4   :  { %957 = vst [vmem:[#allocation8] sm:$0xff] %v955_v15 }
 0x1e5   :  { %968 = dma.vmem_to_hbm [thread:$0]  %s964_s16, 128, %s966_s19, [#allocation4]  }
 0x1e6   :  { %1262 = dma.done.wait [#allocation4], 128  }
 0x1e7   :  { %1263 = vsyncadd [#allocation4], 4294967168 }
 0x1e8   :  { %973 = vsyncpa [#allocation3], 1 }
 0x1e9   :  { %974 = vsyncpa [#allocation6], 1 }
 0x1ea   :  { %975 = vsyncpa [#allocation4], 1 }

</bundles_post_ra>
